<compile_context>
chip_gen: v7x
topology: tpu7x:2x2x1
jax: 0.10.0
libtpu: 0.0.40
codegen_flags: <defaults>
</compile_context>

<pallas_src>
import jax
import jax.numpy as jnp
from jax import lax
from jax.experimental import pallas as pl
from jax.experimental.pallas import tpu as pltpu

NUM_ENCODING_FUNCTIONS = 6
XYZ_ENC = 3 + 3 * 2 * NUM_ENCODING_FUNCTIONS          # 39
VIEWDIR_ENC = 3 + 3 * 2 * NUM_ENCODING_FUNCTIONS      # 39 (use_viewdirs=True)
D_IN = XYZ_ENC + VIEWDIR_ENC                          # 78
FILTER_SIZE = 128
D_OUT = 4

# rhs-transposed ("NT") matmul dimension numbers: contract lhs dim 1 w/ rhs dim 1.
_NT_DIMS = (((1,), (1,)), ((), ()))


def _round_up(x, m):
    return (x + m - 1) // m * m


def _nerf_mlp_kernel(x_ref, w1_ref, b1_ref, w2_ref, b2_ref, w3t_ref, b3t_ref,
                     o_ref):
    """Fused 3-layer MLP: relu(L1) -> relu(L2) -> L3 (output transposed)."""
    # bf16 operands on the MXU, f32 accumulation.
    x = x_ref[...].astype(jnp.bfloat16)                           # (tile_n, 78)

    # layer1 + ReLU
    h1 = jnp.dot(x, w1_ref[...], preferred_element_type=jnp.float32)
    h1 = jnp.maximum(h1 + b1_ref[...], 0.0).astype(jnp.bfloat16)  # (tile_n, 128)

    # layer2 + ReLU
    h2 = jnp.dot(h1, w2_ref[...], preferred_element_type=jnp.float32)
    h2 = jnp.maximum(h2 + b2_ref[...], 0.0).astype(jnp.bfloat16)  # (tile_n, 128)

    # layer3, computed transposed so the output block is lane-dense:
    #   (4, 128) @ (tile_n, 128)^T -> (4, tile_n)
    out_t = lax.dot_general(w3t_ref[...], h2, _NT_DIMS,
                            preferred_element_type=jnp.float32)
    out_t = out_t + b3t_ref[...]                                  # bias (4, 1)

    o_ref[...] = out_t.astype(o_ref.dtype)


def _pick_tile_n(N, tile_n):
    """Clamp tile_n: multiple of 256, <= problem, <= 8192, >= 2 grid steps."""
    tile_n = int(tile_n)
    tile_n = max(256, min(_round_up(tile_n, 256), _round_up(N, 256), 8192))
    # Keep at least 2 grid steps when N allows it so the ("parallel",) row axis
    # can be split across v7x's two TensorCores.
    if N > 256 and pl.cdiv(N, tile_n) < 2:
        tile_n = _round_up(pl.cdiv(N, 2), 256)
    return tile_n


def _vmem_limit_bytes(tile_n, x_itemsize, out_itemsize):
    """Generous per-step VMEM estimate, capped to what v7x can grant safely."""
    x_tile = tile_n * D_IN * x_itemsize
    out_tile = D_OUT * tile_n * out_itemsize
    hidden = tile_n * FILTER_SIZE * (4 + 2) * 2          # h1/h2 in f32 + bf16
    weights = (D_IN + FILTER_SIZE + D_OUT) * FILTER_SIZE * 2 * 2 + (1 << 14)
    est = 2 * (x_tile + out_tile) + hidden + weights      # double-buffered I/O
    # 2x headroom for compiler temporaries; never below the 32 MiB default,
    # never above 48 MiB (safe on v7x's 64 MiB physical VMEM).
    return int(min(max(2 * est, 32 << 20), 48 << 20))


def very_tiny_nerf_forward(x, params, *, tile_n=4096, out_dtype=jnp.float32,
                           transposed_output=False):
    """Run the VeryTinyNeRFModel forward pass.

    x:      [N, D_IN] float (any N, any float dtype; bf16 x halves HBM traffic).
    params: dict with w1 [D_IN,128], b1 [1,128], w2 [128,128], b2 [1,128],
            w3 [128,4], b3 [1,4]   (i.e. W stored as [in, out], PyTorch W^T).
    Returns [N, 4] (module semantics) or [4, N] if transposed_output=True
    (skips the final 32 B/row transpose pass for consumers that can take it).
    """
    N, d_in = x.shape
    assert d_in == D_IN

    tile_n = _pick_tile_n(N, tile_n)
    grid = (pl.cdiv(N, tile_n),)          # ragged last block handled by Pallas

    # Weights in bf16 (MXU-native), biases in f32 (added to f32 accumulators).
    w1 = params["w1"].astype(jnp.bfloat16)                       # (78, 128)
    b1 = params["b1"].reshape(1, FILTER_SIZE).astype(jnp.float32)
    w2 = params["w2"].astype(jnp.bfloat16)                       # (128, 128)
    b2 = params["b2"].reshape(1, FILTER_SIZE).astype(jnp.float32)
    w3t = params["w3"].T.astype(jnp.bfloat16)                    # (4, 128)
    b3t = params["b3"].reshape(D_OUT, 1).astype(jnp.float32)     # (4, 1)

    out_itemsize = jnp.dtype(out_dtype).itemsize
    flops = 2 * N * (D_IN * FILTER_SIZE
                     + FILTER_SIZE * FILTER_SIZE
                     + FILTER_SIZE * D_OUT)
    bytes_accessed = int(
        N * D_IN * x.dtype.itemsize                    # x read
        + N * D_OUT * out_itemsize                     # output write
        + (D_IN * FILTER_SIZE + FILTER_SIZE * FILTER_SIZE
           + FILTER_SIZE * D_OUT) * 2                  # bf16 weights
        + (2 * FILTER_SIZE + D_OUT) * 4)               # f32 biases

    const = lambda i: (0, 0)  # weights/biases: one resident block for all steps

    out_t = pl.pallas_call(
        _nerf_mlp_kernel,
        out_shape=jax.ShapeDtypeStruct((D_OUT, N), out_dtype),
        grid_spec=pltpu.PrefetchScalarGridSpec(
            num_scalar_prefetch=0,
            grid=grid,
            in_specs=[
                pl.BlockSpec((tile_n, D_IN), lambda i: (i, 0)),      # x tile
                pl.BlockSpec((D_IN, FILTER_SIZE), const),            # w1
                pl.BlockSpec((1, FILTER_SIZE), const),               # b1
                pl.BlockSpec((FILTER_SIZE, FILTER_SIZE), const),     # w2
                pl.BlockSpec((1, FILTER_SIZE), const),               # b2
                pl.BlockSpec((D_OUT, FILTER_SIZE), const),           # w3^T
                pl.BlockSpec((D_OUT, 1), const),                     # b3^T
            ],
            out_specs=pl.BlockSpec((D_OUT, tile_n), lambda i: (0, i)),
        ),
        compiler_params=pltpu.CompilerParams(
            dimension_semantics=("parallel",),
            vmem_limit_bytes=_vmem_limit_bytes(
                tile_n, x.dtype.itemsize, out_itemsize)),
        cost_estimate=pl.CostEstimate(
            flops=flops, transcendentals=0, bytes_accessed=bytes_accessed),
    )(x, w1, b1, w2, b2, w3t, b3t)

    if transposed_output:
        return out_t                       # (4, N), lane-dense, no extra pass
    # Module semantics: (N, 4). One tiny (16 B/row) transpose pass.
    return out_t.T


def init_params(key):
    """Deterministic parameter init matching the PyTorch module's shapes.

    PyTorch nn.Linear(in, out) stores weight [out, in]; we store the transpose
    [in, out] so the math is x @ W + b (identical result).
    """
    ks = jax.random.split(key, 6)

    def uniform(k, shape, fan_in):
        bound = 1.0 / jnp.sqrt(fan_in)
        return jax.random.uniform(k, shape, jnp.float32, -bound, bound)

    return {
        "w1": uniform(ks[0], (D_IN, FILTER_SIZE), D_IN),
        "b1": uniform(ks[1], (1, FILTER_SIZE), D_IN),
        "w2": uniform(ks[2], (FILTER_SIZE, FILTER_SIZE), FILTER_SIZE),
        "b2": uniform(ks[3], (1, FILTER_SIZE), FILTER_SIZE),
        "w3": uniform(ks[4], (FILTER_SIZE, D_OUT), FILTER_SIZE),
        "b3": uniform(ks[5], (1, D_OUT), FILTER_SIZE),
    }


def reference_forward(x, p):
    h = jnp.maximum(x @ p["w1"] + p["b1"], 0.0)
    h = jnp.maximum(h @ p["w2"] + p["b2"], 0.0)
    return h @ p["w3"] + p["b3"]


if __name__ == "__main__":
    key = jax.random.PRNGKey(0)
    k_x, k_p = jax.random.split(key)

    # Small, non-multiple-of-tile N: exercises the ragged final block (no pad)
    # and a >=2-step grid (tile_n auto-clamps 4096 -> 512 here).
    N = 1000
    x = jax.random.normal(k_x, (N, D_IN), dtype=jnp.float32)
    params = init_params(k_p)

    out = very_tiny_nerf_forward(x, params)
    out = jax.block_until_ready(out)

    ref = reference_forward(x, params)
    assert out.shape == (N, D_OUT), out.shape
    # bf16 matmul operands (f32 accumulation) -> loosened tolerance vs f32 ref.
    assert jnp.allclose(out, ref, atol=3e-2, rtol=3e-2), \
        float(jnp.max(jnp.abs(out - ref)))

    print("KERNEL_OK")
</pallas_src>

<mosaic_0001>
module attributes {stable_mosaic.version = 11 : i64} {
  func.func @_nerf_mlp_kernel(%arg0: i32, %arg1: memref<512x78xf32, #tpu.memory_space<vmem>>, %arg2: memref<78x128xbf16, #tpu.memory_space<vmem>>, %arg3: memref<1x128xf32, #tpu.memory_space<vmem>>, %arg4: memref<128x128xbf16, #tpu.memory_space<vmem>>, %arg5: memref<1x128xf32, #tpu.memory_space<vmem>>, %arg6: memref<4x128xbf16, #tpu.memory_space<vmem>>, %arg7: memref<4x1xf32, #tpu.memory_space<vmem>>, %arg8: memref<4x512xf32, #tpu.memory_space<vmem>>) attributes {dimension_semantics = [#tpu.dimension_semantics<parallel>], iteration_bounds = array<i64: 2>, scalar_prefetch = 0 : i64, scratch_operands = 0 : i64, tpu.core_type = #tpu.core_type<tc>, window_params = [{transform_indices = @transform_0, window_bounds = array<i64: 512, 78>}, {pipeline_mode = #tpu.pipeline_mode<synchronous>, transform_indices = @transform_1, window_bounds = array<i64: 78, 128>}, {pipeline_mode = #tpu.pipeline_mode<synchronous>, transform_indices = @transform_2, window_bounds = array<i64: 1, 128>}, {pipeline_mode = #tpu.pipeline_mode<synchronous>, transform_indices = @transform_3, window_bounds = array<i64: 128, 128>}, {pipeline_mode = #tpu.pipeline_mode<synchronous>, transform_indices = @transform_4, window_bounds = array<i64: 1, 128>}, {pipeline_mode = #tpu.pipeline_mode<synchronous>, transform_indices = @transform_5, window_bounds = array<i64: 4, 128>}, {pipeline_mode = #tpu.pipeline_mode<synchronous>, transform_indices = @transform_6, window_bounds = array<i64: 4, 1>}, {transform_indices = @transform_7, window_bounds = array<i64: 4, 512>}]} {
    %c0 = arith.constant 0 : index
    %c0_0 = arith.constant 0 : index
    %0 = vector.load %arg1[%c0, %c0_0] : memref<512x78xf32, #tpu.memory_space<vmem>>, vector<512x78xf32>
    %1 = arith.truncf %0 : vector<512x78xf32> to vector<512x78xbf16>
    %c0_1 = arith.constant 0 : index
    %c0_2 = arith.constant 0 : index
    %2 = vector.load %arg2[%c0_1, %c0_2] : memref<78x128xbf16, #tpu.memory_space<vmem>>, vector<78x128xbf16>
    %cst = arith.constant dense<0.000000e+00> : vector<512x128xf32>
    %3 = tpu.matmul %1, %2, %cst {dimension_numbers = #tpu.dot_dimension_numbers<[1], [0], [0], [1], [0, 0, 1, 1], [], []>} : vector<512x78xbf16>, vector<78x128xbf16>, vector<512x128xf32> -> vector<512x128xf32>
    %c0_3 = arith.constant 0 : index
    %c0_4 = arith.constant 0 : index
    %4 = vector.load %arg3[%c0_3, %c0_4] : memref<1x128xf32, #tpu.memory_space<vmem>>, vector<1x128xf32>
    %5 = vector.broadcast %4 : vector<1x128xf32> to vector<512x128xf32>
    %6 = arith.addf %3, %5 : vector<512x128xf32>
    %cst_5 = arith.constant 0.000000e+00 : f32
    %7 = vector.broadcast %cst_5 : f32 to vector<512x128xf32>
    %8 = arith.maximumf %6, %7 : vector<512x128xf32>
    %9 = arith.truncf %8 : vector<512x128xf32> to vector<512x128xbf16>
    %c0_6 = arith.constant 0 : index
    %c0_7 = arith.constant 0 : index
    %10 = vector.load %arg4[%c0_6, %c0_7] : memref<128x128xbf16, #tpu.memory_space<vmem>>, vector<128x128xbf16>
    %cst_8 = arith.constant dense<0.000000e+00> : vector<512x128xf32>
    %11 = tpu.matmul %9, %10, %cst_8 {dimension_numbers = #tpu.dot_dimension_numbers<[1], [0], [0], [1], [0, 0, 1, 1], [], []>} : vector<512x128xbf16>, vector<128x128xbf16>, vector<512x128xf32> -> vector<512x128xf32>
    %c0_9 = arith.constant 0 : index
    %c0_10 = arith.constant 0 : index
    %12 = vector.load %arg5[%c0_9, %c0_10] : memref<1x128xf32, #tpu.memory_space<vmem>>, vector<1x128xf32>
    %13 = vector.broadcast %12 : vector<1x128xf32> to vector<512x128xf32>
    %14 = arith.addf %11, %13 : vector<512x128xf32>
    %cst_11 = arith.constant 0.000000e+00 : f32
    %15 = vector.broadcast %cst_11 : f32 to vector<512x128xf32>
    %16 = arith.maximumf %14, %15 : vector<512x128xf32>
    %17 = arith.truncf %16 : vector<512x128xf32> to vector<512x128xbf16>
    %c0_12 = arith.constant 0 : index
    %c0_13 = arith.constant 0 : index
    %18 = vector.load %arg6[%c0_12, %c0_13] : memref<4x128xbf16, #tpu.memory_space<vmem>>, vector<4x128xbf16>
    %cst_14 = arith.constant dense<0.000000e+00> : vector<4x512xf32>
    %19 = tpu.matmul %18, %17, %cst_14 {dimension_numbers = #tpu.dot_dimension_numbers<[1], [1], [0], [0], [0, 0, 1, 0], [], []>} : vector<4x128xbf16>, vector<512x128xbf16>, vector<4x512xf32> -> vector<4x512xf32>
    %c0_15 = arith.constant 0 : index
    %c0_16 = arith.constant 0 : index
    %20 = vector.load %arg7[%c0_15, %c0_16] : memref<4x1xf32, #tpu.memory_space<vmem>>, vector<4x1xf32>
    %21 = vector.broadcast %20 : vector<4x1xf32> to vector<4x512xf32>
    %22 = arith.addf %19, %21 : vector<4x512xf32>
    %c0_17 = arith.constant 0 : index
    %c0_18 = arith.constant 0 : index
    %23 = vector.load %arg8[%c0_17, %c0_18] : memref<4x512xf32, #tpu.memory_space<vmem>>, vector<4x512xf32>
    tpu.vector_store %arg8[%c0_17, %c0_18], %22 {strides = array<i32>} : memref<4x512xf32, #tpu.memory_space<vmem>>, vector<4x512xf32>,
    return
  }
  func.func @transform_0(%arg0: i32) -> (i32, i32) {
    %c0_i32 = arith.constant 0 : i32
    %c0_i32_0 = arith.constant 0 : i32
    return %arg0, %c0_i32 : i32, i32
  }
  func.func @transform_1(%arg0: i32) -> (i32, i32) {
    %c0_i32 = arith.constant 0 : i32
    %c0_i32_0 = arith.constant 0 : i32
    %c0_i32_1 = arith.constant 0 : i32
    return %c0_i32, %c0_i32_0 : i32, i32
  }
  func.func @transform_2(%arg0: i32) -> (i32, i32) {
    %c0_i32 = arith.constant 0 : i32
    %c0_i32_0 = arith.constant 0 : i32
    %c0_i32_1 = arith.constant 0 : i32
    return %c0_i32, %c0_i32_0 : i32, i32
  }
  func.func @transform_3(%arg0: i32) -> (i32, i32) {
    %c0_i32 = arith.constant 0 : i32
    %c0_i32_0 = arith.constant 0 : i32
    %c0_i32_1 = arith.constant 0 : i32
    return %c0_i32, %c0_i32_0 : i32, i32
  }
  func.func @transform_4(%arg0: i32) -> (i32, i32) {
    %c0_i32 = arith.constant 0 : i32
    %c0_i32_0 = arith.constant 0 : i32
    %c0_i32_1 = arith.constant 0 : i32
    return %c0_i32, %c0_i32_0 : i32, i32
  }
  func.func @transform_5(%arg0: i32) -> (i32, i32) {
    %c0_i32 = arith.constant 0 : i32
    %c0_i32_0 = arith.constant 0 : i32
    %c0_i32_1 = arith.constant 0 : i32
    return %c0_i32, %c0_i32_0 : i32, i32
  }
  func.func @transform_6(%arg0: i32) -> (i32, i32) {
    %c0_i32 = arith.constant 0 : i32
    %c0_i32_0 = arith.constant 0 : i32
    %c0_i32_1 = arith.constant 0 : i32
    return %c0_i32, %c0_i32_0 : i32, i32
  }
  func.func @transform_7(%arg0: i32) -> (i32, i32) {
    %c0_i32 = arith.constant 0 : i32
    %c0_i32_0 = arith.constant 0 : i32
    return %c0_i32, %arg0 : i32, i32
  }
}

</mosaic_0001>

<bundles_post_ra>
// kernel: tpu_custom_call.1
= control target key start
LH: loop header
LB: loop body
LE: loop exit
PB: predicated region body
PF: predicated region fallthrough
CT: control target
= control target key end

     0   :  { %12 = vsyncpa [#allocation3], 0  ;;  %s2480_s0 = inlined_call_operand.vmem [shape: f32[1000,78], index: 0, kind: input, shape index: {}]   ;;  %s2481_s1 = inlined_call_operand.vmem [shape: bf16[78,128], index: 1, kind: input, shape index: {}]   ;;  %s2482_s2 = inlined_call_operand.vmem [shape: f32[1,128], index: 2, kind: input, shape index: {}]   ;;  %s2483_s3 = inlined_call_operand.vmem [shape: bf16[128,128], index: 3, kind: input, shape index: {}]   ;;  %s2484_s4 = inlined_call_operand.vmem [shape: f32[1,128], index: 4, kind: input, shape index: {}]   ;;  %s2485_s5 = inlined_call_operand.vmem [shape: bf16[4,128], index: 5, kind: input, shape index: {}]   ;;  %s2486_s6 = inlined_call_operand.vmem [shape: f32[4,1], index: 6, kind: input, shape index: {}]   ;;  %s2487_s7 = inlined_call_operand.hbm [shape: f32[4,1000], index: 7, kind: output, shape index: {}]  }
   0x1   :  { %14 = vsyncpa [#allocation3 + $0x1], 0  ;;  %s2046_s24 = smov 0   ;;  %s2048_s25 = smov 0  }
   0x2   :  { %s2050_s26 = smov 0   ;;  %s2052_s27 = smov 0  }
   0x3 LB: > { %s2067_s28 = sadd.s32 4294967295, %s2002_s27   ;;  %s1558_s29 = sadd.s32 4294967294, %s2002_s27   ;;  %s2002_s27 = sphi %s2052_s27, %s2493_s27   ;;  %s1998_s26 = sphi %s2050_s26, %s2492_s26   ;;  %s1994_s25 = sphi %s2048_s25, %s2491_s25   ;;  %s1990_s24 = sphi %s2046_s24, %s2490_s24  }
   0x4   : > { %s2071_s30 = sadd.s32 1, %s2002_s27   ;;  %s179_s8 = sadd.s32 1, %s1998_s26 }
   0x5   : > { %s176_s9 = ssub.s32 %s2002_s27, %s2071_s30  ;;  %p189_p0 = scmp.ne.s32.totalorder %s1998_s26, %s1994_s25 }
   0x6   : > { %p177_p1 = scmp.eq.s32.totalorder %s176_s9, 0  ;;  %p190_p2 = scmp.eq.s32.totalorder %s2067_s28, 1 }
   0x7   : > { %p195_p3 = scmp.ne.s32.totalorder %s1994_s25, %s1990_s24  ;;  %p196_p4 = scmp.eq.s32.totalorder %s1558_s29, 1 }
   0x8   : > { %s2082_s10 = scalar_select %p177_p1, %s1998_s26, %s179_s8  }
   0x9   : > { %p2084_p5 = por %p190_p2, %p189_p0  ;;  %p2088_p6 = por %p196_p4, %p195_p3 }
   0xa   : > { %p1561_p7 = scmp.ge.s32.totalorder %s2002_s27, 1  ;;  %p249_p8 = scmp.lt.s32.totalorder %s2002_s27, 3 }
   0xc   : > { %p250_p9 = pnand %p1561_p7, %p249_p8 }
   0xd   : > { %v1927_v0 = vld [vmem:[%s2481_s1] sm:$0xff] (!%p250_p9)   ;;  %v1928_v1 = vld [vmem:[%s2481_s1 + $0x8] sm:$0xff] (!%p250_p9)   ;;  %s1563_s17 = sshll.u32 (!%p250_p9), %s2067_s28, 6  ;;  %v1929_v2 = vld [vmem:[%s2481_s1 + $0x10] sm:$0xff] (!%p250_p9)   ;;  %vm443_vm0 = vcmask (!%p250_p9), 637952   ;;  %vm540_vm1 = vcmask (!%p250_p9), 1046528  }
   0xe   : > { %253 = sbr.rel (%p250_p9) target bundleno = 868 (0x364), region = 48  ;;  %1731 = vmatprep.subr.bf16.mxu0 (!%p250_p9), %v1927_v0  ;;  %p290_p10 = scmp.lt.s32.totalorder (!%p250_p9), %s1563_s17, 124  ;;  %v1930_v3 = vld [vmem:[%s2481_s1 + $0x18] sm:$0xff] (!%p250_p9)   ;;  %v1931_v7 = vld [vmem:[%s2481_s1 + $0x20] sm:$0x7f] (!%p250_p9)   ;;  %v1933_v23 = vld [vmem:[%s2483_s3 + $0x8] sm:$0xff] (!%p250_p9)  }
   0xf   : > { %1732 = vmatpush3.bf16.msra.mxu0 (!%p250_p9), %v1927_v0  ;;  %v542_v10 = vsel (!%p250_p9), %vm540_vm1, %v1931_v7, 0  ;;  %v1932_v22 = vld [vmem:[%s2483_s3] sm:$0xff] (!%p250_p9)   ;;  %v1934_v28 = vld [vmem:[%s2483_s3 + $0x10] sm:$0xff] (!%p250_p9)   ;;  %v1935_v30 = vld [vmem:[%s2483_s3 + $0x18] sm:$0xff] (!%p250_p9)   ;;  %s282_s29 = sand.u32 (!%p250_p9), 1, %s1994_s25   ;;  %s1617_s14 = sshll.u32 (!%p250_p9), %s2067_s28, 8 }
  0x10   : > { %1733 = vmatprep.subr.bf16.mxu0 (!%p250_p9), %v1928_v1  ;;  %1805 = vmatprep.subr.bf16.mxu1 (!%p250_p9), %v1932_v22  ;;  %v1936_v36 = vld [vmem:[%s2483_s3 + $0x20] sm:$0xff] (!%p250_p9)   ;;  %v1937_v38 = vld [vmem:[%s2483_s3 + $0x28] sm:$0xff] (!%p250_p9)   ;;  %s1562_s9 = sshll.u32 (!%p250_p9), %s282_s29, 4  ;;  %s2438_s18 = scalar_lea.hbm (!%p250_p9), %s2487_s7, %s1617_s14 }
  0x11   : > { %1806 = vmatpush3.bf16.msra.mxu1 (!%p250_p9), %v1932_v22  ;;  %v1938_v22 = vld [vmem:[%s2483_s3 + $0x30] sm:$0xff] (!%p250_p9)   ;;  %s284_s13 = scalar_lea.vmem (!%p250_p9), [#allocation2], %s1562_s9  ;;  %s2005_s28 = smov (!%p250_p9), [#allocation2]  }
  0x12   : > { %1807 = vmatprep.subr.bf16.mxu1 (!%p250_p9), %v1933_v23  ;;  %s1499_s15 = sshll.u32 (!%p250_p9), %s284_s13, 4  ;;  %s1944_s20 = sshll.u32 (!%p250_p9), %s2005_s28, 4  ;;  %s2440_s15 = int_to_ptr.vmem [resolvable:$true] %s1499_s15  ;;  %s1945_s20 = int_to_ptr.vmem [resolvable:$false] %s1944_s20 }
  0x13   : > { %1734 = vmatpush3.bf16.msra.mxu0 (!%p250_p9), %v1928_v1  ;;  %s1940_s19 = scalar_lea.vmem (!%p250_p9), %s2440_s15, 256  ;;  %s1946_s21 = scalar_lea.vmem (!%p250_p9), %s1945_s20, 512 }
  0x14   : > { %1735 = vmatprep.subr.bf16.mxu0 (!%p250_p9), %v1929_v2  ;;  %p1941_p11 = scmp.ne.s32.totalorder (!%p250_p9), %s2440_s15, %s1940_s19  ;;  %p1947_p0 = scmp.lt.s32.totalorder (!%p250_p9), %s2440_s15, %s1945_s20 }
  0x15   : > { %s2495_s17 = smov (!%p290_p10, %s1563_s17), 124  ;;  %1808 = vmatpush3.bf16.msra.mxu1 %v1933_v23  ;;  %p1948_p1 = scmp.lt.s32.totalorder %s1946_s21, %s1940_s19 }
  0x16   : > { %s1564_s22 = sshll.u32 %s2495_s17, 3  ;;  %1809 = vmatprep.subr.bf16.mxu1 %v1934_v28  ;;  %p1942_p12 = pnand %p1941_p11, %p2084_p5 }
  0x17   : > { %s2110_s8 = scalar_lea.vmem %s2480_s0, %s1564_s22  ;;  %1736 = vmatpush3.bf16.msra.mxu0 %v1929_v2  ;;  %p1949_p2 = por %p1948_p1, %p1947_p0 }
  0x18   : > { %v301_v4 = vld [vmem:[%s2110_s8] sm:$0xff]  ;;  %v302_v5 = vld [vmem:[%s2110_s8 + $0x8] sm:$0xff]  ;;  %1737 = vmatprep.subr.bf16.mxu0 %v1930_v3  ;;  %v303_v8 = vld [vmem:[%s2110_s8 + $0x10] sm:$0xff]  ;;  %p1943_p13 = pneg %p1942_p12 }
  0x19   : > { %v365_v6 = vpack.c.bf16 %v302_v5, %v301_v4  ;;  %v304_v9 = vld [vmem:[%s2110_s8 + $0x18] sm:$0xff]  ;;  %v305_v11 = vld [vmem:[%s2110_s8 + $0x20] sm:$0xff]  ;;  %v306_v12 = vld [vmem:[%s2110_s8 + $0x28] sm:$0xff]  ;;  %1810 = vmatpush3.bf16.msra.mxu1 %v1934_v28 }
  0x1a   : > { %v366_v13 = vpack.c.bf16 %v304_v9, %v303_v8  ;;  %v367_v14 = vpack.c.bf16 %v306_v12, %v305_v11  ;;  %v307_v15 = vld [vmem:[%s2110_s8 + $0x30] sm:$0xff]  ;;  %v308_v16 = vld [vmem:[%s2110_s8 + $0x38] sm:$0xff]  ;;  %v309_v17 = vld [vmem:[%s2110_s8 + $0x40] sm:$0xff]  ;;  %1811 = vmatprep.subr.bf16.mxu1 %v1935_v30  ;;  %p1950_p3 = pnand %p1949_p2, %p1943_p13 }
  0x1b   : > { %1741 = vmatprep.mubr.msk.bf16.mxu0 %vm443_vm0, %v365_v6  ;;  %1738 = vmatpush3.bf16.msra.mxu0 %v1930_v3  ;;  %v310_v18 = vld [vmem:[%s2110_s8 + $0x48] sm:$0xff]  ;;  %v368_v19 = vpack.c.bf16 %v308_v16, %v307_v15  ;;  %v311_v21 = vld [vmem:[%s2110_s8 + $0x50] sm:$0xff]  ;;  %v312_v24 = vld [vmem:[%s2110_s8 + $0x58] sm:$0xff] }
  0x1c   : > { %1885 = vmatprep.subr.msk.bf16.mxu0 %vm540_vm1, %v1931_v7  ;;  %v369_v20 = vpack.c.bf16 %v310_v18, %v309_v17  ;;  %v313_v25 = vld [vmem:[%s2110_s8 + $0x60] sm:$0xff]  ;;  %v314_v26 = vld [vmem:[%s2110_s8 + $0x68] sm:$0xff]  ;;  %v370_v27 = vpack.c.bf16 %v312_v24, %v311_v21  ;;  %v315_v31 = vld [vmem:[%s2110_s8 + $0x70] sm:$0xff] }
  0x1d   : > { %v371_v29 = vpack.c.bf16 %v314_v26, %v313_v25  ;;  %v316_v32 = vld [vmem:[%s2110_s8 + $0x78] sm:$0xff]  ;;  %v317_v33 = vld [vmem:[%s2110_s8 + $0x80] sm:$0xff]  ;;  %v318_v34 = vld [vmem:[%s2110_s8 + $0x88] sm:$0xff]  ;;  %1812 = vmatpush3.bf16.msra.mxu1 %v1935_v30 }
  0x1e   : > { %v372_v35 = vpack.c.bf16 %v316_v32, %v315_v31  ;;  %v373_v37 = vpack.c.bf16 %v318_v34, %v317_v33  ;;  %1813 = vmatprep.subr.bf16.mxu1 %v1936_v36  ;;  %v319_v39 = vld [vmem:[%s2110_s8 + $0x90] sm:$0xff]  ;;  %v320_v40 = vld [vmem:[%s2110_s8 + $0x98] sm:$0xff]  ;;  %v321_v41 = vld [vmem:[%s2110_s8 + $0xa0] sm:$0xff] }
  0x1f   : > { %1740 = vmatpush3.bf16.msra.mxu0 %v542_v10  ;;  %v322_v42 = vld [vmem:[%s2110_s8 + $0xa8] sm:$0xff]  ;;  %v374_v43 = vpack.c.bf16 %v320_v40, %v319_v39  ;;  %v323_v45 = vld [vmem:[%s2110_s8 + $0xb0] sm:$0xff]  ;;  %v324_v46 = vld [vmem:[%s2110_s8 + $0xb8] sm:$0xff] }
  0x20   : > { %v375_v44 = vpack.c.bf16 %v322_v42, %v321_v41  ;;  %v325_v47 = vld [vmem:[%s2110_s8 + $0xc0] sm:$0xff]  ;;  %v326_v48 = vld [vmem:[%s2110_s8 + $0xc8] sm:$0xff]  ;;  %v376_v49 = vpack.c.bf16 %v324_v46, %v323_v45  ;;  %v327_v51 = vld [vmem:[%s2110_s8 + $0xd0] sm:$0xff] }
  0x21   : > { %1814 = vmatpush3.bf16.msra.mxu1 %v1936_v36  ;;  %v377_v50 = vpack.c.bf16 %v326_v48, %v325_v47  ;;  %v328_v52 = vld [vmem:[%s2110_s8 + $0xd8] sm:$0xff]  ;;  %v329_v53 = vld [vmem:[%s2110_s8 + $0xe0] sm:$0xff]  ;;  %v330_v54 = vld [vmem:[%s2110_s8 + $0xe8] sm:$0xff] }
  0x22   : > { %1742 = vmatmul.mubr.msk.bf16.vlgmr.msra.gmra.mrb[0].mxu0 %vm443_vm0, %v366_v13  ;;  %1815 = vmatprep.subr.bf16.mxu1 %v1937_v38  ;;  %v378_v55 = vpack.c.bf16 %v328_v52, %v327_v51  ;;  %v379_v56 = vpack.c.bf16 %v330_v54, %v329_v53  ;;  %v331_v57 = vld [vmem:[%s2110_s8 + $0xf0] sm:$0xff]  ;;  %v332_v58 = vld [vmem:[%s2110_s8 + $0xf8] sm:$0xff]  ;;  %v333_v59 = vld [vmem:[%s2110_s8 + $0x100] sm:$0xff] }
  0x23   : > { %1745 = vmatprep.mubr.msk.bf16.mxu0 %vm443_vm0, %v367_v14  ;;  %v334_v60 = vld [vmem:[%s2110_s8 + $0x108] sm:$0xff]  ;;  %v380_v61 = vpack.c.bf16 %v332_v58, %v331_v57  ;;  %v335_v63 = vld [vmem:[%s2110_s8 + $0x110] sm:$0xff]  ;;  %v336_v0 = vld [vmem:[%s2110_s8 + $0x118] sm:$0xff] }
  0x24   : > { %v381_v62 = vpack.c.bf16 %v334_v60, %v333_v59  ;;  %v337_v1 = vld [vmem:[%s2110_s8 + $0x120] sm:$0xff]  ;;  %v338_v2 = vld [vmem:[%s2110_s8 + $0x128] sm:$0xff]  ;;  %v382_v3 = vpack.c.bf16 %v336_v0, %v335_v63  ;;  %v339_v5 = vld [vmem:[%s2110_s8 + $0x130] sm:$0xff] }
  0x25   : > { %1816 = vmatpush3.bf16.msra.mxu1 %v1937_v38  ;;  %v383_v4 = vpack.c.bf16 %v338_v2, %v337_v1  ;;  %v340_v6 = vld [vmem:[%s2110_s8 + $0x138] sm:$0xff]  ;;  %v341_v7 = vld [vmem:[%s2110_s8 + $0x140] sm:$0xff]  ;;  %v342_v8 = vld [vmem:[%s2110_s8 + $0x148] sm:$0xff] }
  0x26   : > { %v384_v9 = vpack.c.bf16 %v340_v6, %v339_v5  ;;  %v385_v10 = vpack.c.bf16 %v342_v8, %v341_v7  ;;  %v343_v11 = vld [vmem:[%s2110_s8 + $0x150] sm:$0xff]  ;;  %v344_v12 = vld [vmem:[%s2110_s8 + $0x158] sm:$0xff]  ;;  %v345_v13 = vld [vmem:[%s2110_s8 + $0x160] sm:$0xff]  ;;  %1817 = vmatprep.subr.bf16.mxu1 %v1938_v22 }
  0x27   : > { %v346_v14 = vld [vmem:[%s2110_s8 + $0x168] sm:$0xff]  ;;  %v386_v15 = vpack.c.bf16 %v344_v12, %v343_v11  ;;  %v347_v17 = vld [vmem:[%s2110_s8 + $0x170] sm:$0xff]  ;;  %v348_v18 = vld [vmem:[%s2110_s8 + $0x178] sm:$0xff] }
  0x28   : > { %v387_v16 = vpack.c.bf16 %v346_v14, %v345_v13  ;;  %v388_v21 = vpack.c.bf16 %v348_v18, %v347_v17  ;;  %v1939_v24 = vld [vmem:[%s2483_s3 + $0x38] sm:$0xff]   ;;  %v351_v25 = vld [vmem:[%s2110_s8 + $0x190] sm:$0xff]  ;;  %v354_v28 = vld [vmem:[%s2110_s8 + $0x1a8] sm:$0xff] }
  0x29   : > { %1818 = vmatpush3.bf16.msra.mxu1 %v1938_v22  ;;  %v352_v26 = vld [vmem:[%s2110_s8 + $0x198] sm:$0xff]  ;;  %v355_v31 = vld [vmem:[%s2110_s8 + $0x1b0] sm:$0xff]  ;;  %v357_v33 = vld [vmem:[%s2110_s8 + $0x1c0] sm:$0xff] }
  0x2a   : > { %1746 = vmatmul.mubr.msk.bf16.gmra.mrb[4].mxu0 %vm443_vm0, %v368_v19  ;;  %v349_v19 = vld [vmem:[%s2110_s8 + $0x180] sm:$0xff]  ;;  %1819 = vmatprep.subr.bf16.mxu1 %v1939_v24  ;;  %v356_v32 = vld [vmem:[%s2110_s8 + $0x1b8] sm:$0xff]  ;;  %v358_v34 = vld [vmem:[%s2110_s8 + $0x1c8] sm:$0xff] }
  0x2b   : > { %1749 = vmatprep.mubr.msk.bf16.mxu0 %vm443_vm0, %v369_v20  ;;  %v350_v20 = vld [vmem:[%s2110_s8 + $0x188] sm:$0xff]  ;;  %v393_v36 = vpack.c.bf16 %v358_v34, %v357_v33  ;;  %v360_v38 = vld [vmem:[%s2110_s8 + $0x1d8] sm:$0xff]  ;;  %v361_v39 = vld [vmem:[%s2110_s8 + $0x1e0] sm:$0xff] }
  0x2c   : > { %v389_v23 = vpack.c.bf16 %v350_v20, %v349_v19  ;;  %v362_v40 = vld [vmem:[%s2110_s8 + $0x1e8] sm:$0xff]  ;;  %v2238_v46 = vld [vmem:[%s2482_s2] ss:$0 sm:$0xff] }
  0x2d   : > { %1820 = vmatpush3.bf16.msra.mxu1 %v1939_v24  ;;  %v395_v42 = vpack.c.bf16 %v362_v40, %v361_v39 }
  0x32   : > { %1750 = vmatmul.mubr.msk.bf16.gmra.mrb[8].mxu0 %vm443_vm0, %v370_v27  ;;  %v353_v27 = vld [vmem:[%s2110_s8 + $0x1a0] sm:$0xff] }
  0x33   : > { %1753 = vmatprep.mubr.msk.bf16.mxu0 %vm443_vm0, %v371_v29  ;;  %v390_v29 = vpack.c.bf16 %v352_v26, %v351_v25  ;;  %v391_v30 = vpack.c.bf16 %v354_v28, %v353_v27 }
  0x3a   : > { %1754 = vmatmul.mubr.msk.bf16.gmra.mrb[12].mxu0 %vm443_vm0, %v372_v35  ;;  %v392_v35 = vpack.c.bf16 %v356_v32, %v355_v31 }
  0x3b   : > { %1757 = vmatprep.mubr.msk.bf16.mxu0 %vm443_vm0, %v373_v37  ;;  %v359_v37 = vld [vmem:[%s2110_s8 + $0x1d0] sm:$0xff] }
  0x3c   : > { %v394_v41 = vpack.c.bf16 %v360_v38, %v359_v37 }
  0x42   : > { %1758 = vmatmul.mubr.msk.bf16.gmra.mrb[16].mxu0 %vm443_vm0, %v374_v43  ;;  %v363_v43 = vld [vmem:[%s2110_s8 + $0x1f0] sm:$0xff] }
  0x43   : > { %1761 = vmatprep.mubr.msk.bf16.mxu0 %vm443_vm0, %v375_v44  ;;  %v364_v44 = vld [vmem:[%s2110_s8 + $0x1f8] sm:$0xff]  ;;  %s1485_s8 = scalar_lea.sflag [#allocation3], %s282_s29 }
  0x44   : > { %v396_v45 = vpack.c.bf16 %v364_v44, %v363_v43 }
  0x4a   : > { %1762 = vmatmul.mubr.msk.bf16.gmra.mrb[20].mxu0 %vm443_vm0, %v376_v49 }
  0x4b   : > { %1765 = vmatprep.mubr.msk.bf16.mxu0 %vm443_vm0, %v377_v50 }
  0x52   : > { %1766 = vmatmul.mubr.msk.bf16.gmra.mrb[24].mxu0 %vm443_vm0, %v378_v55 }
  0x53   : > { %1769 = vmatprep.mubr.msk.bf16.mxu0 %vm443_vm0, %v379_v56 }
  0x5a   : > { %1770 = vmatmul.mubr.msk.bf16.gmra.mrb[28].mxu0 %vm443_vm0, %v380_v61 }
  0x5b   : > { %1773 = vmatprep.mubr.msk.bf16.mxu0 %vm443_vm0, %v381_v62 }
  0x62   : > { %1774 = vmatmul.mubr.msk.bf16.gmra.mrb[32].mxu0 %vm443_vm0, %v382_v3 }
  0x63   : > { %1777 = vmatprep.mubr.msk.bf16.mxu0 %vm443_vm0, %v383_v4 }
  0x6a   : > { %1778 = vmatmul.mubr.msk.bf16.gmra.mrb[36].mxu0 %vm443_vm0, %v384_v9 }
  0x6b   : > { %1781 = vmatprep.mubr.msk.bf16.mxu0 %vm443_vm0, %v385_v10 }
  0x72   : > { %1782 = vmatmul.mubr.msk.bf16.gmra.mrb[40].mxu0 %vm443_vm0, %v386_v15 }
  0x73   : > { %1785 = vmatprep.mubr.msk.bf16.mxu0 %vm443_vm0, %v387_v16 }
  0x7a   : > { %1786 = vmatmul.mubr.msk.bf16.gmra.mrb[44].mxu0 %vm443_vm0, %v388_v21 }
  0x7b   : > { %1789 = vmatprep.mubr.msk.bf16.mxu0 %vm443_vm0, %v389_v23 }
  0x82   : > { %1790 = vmatmul.mubr.msk.bf16.gmra.mrb[48].mxu0 %vm443_vm0, %v390_v29 }
  0x83   : > { %1793 = vmatprep.mubr.msk.bf16.mxu0 %vm443_vm0, %v391_v30 }
  0x8a   : > { %1794 = vmatmul.mubr.msk.bf16.gmra.mrb[52].mxu0 %vm443_vm0, %v392_v35 }
  0x8b   : > { %1797 = vmatprep.mubr.msk.bf16.mxu0 %vm443_vm0, %v393_v36 }
  0x92   : > { %1798 = vmatmul.mubr.msk.bf16.gmra.mrb[56].mxu0 %vm443_vm0, %v394_v41 }
  0x93   : > { %1801 = vmatprep.mubr.msk.bf16.mxu0 %vm443_vm0, %v395_v42 }
  0x9a   : > { %1802 = vmatmul.mubr.msk.bf16.gmra.mrb[60].mxu0 %vm443_vm0, %v396_v45 }
  0xf5   : > { %v1743_v47 = vpop.f32.mrb[0].mxu0 }
  0xf6   : > { %v587_v48 = vadd.f32 %v1743_v47, %v2238_v46  ;;  %v578_v49 = vpop.f32.mrb[1].mxu0 }
  0xf7   : > { %v579_v50 = vadd.f32 %v2238_v46, %v578_v49  ;;  %v1744_v51 = vpop.f32.mrb[2].mxu0 }
  0xf8   : > { %v590_v52 = vadd.f32 %v1744_v51, %v2238_v46  ;;  %v581_v53 = vpop.f32.mrb[3].mxu0  ;;  %v835_v55 = vmax.f32 %v587_v48, 0.0 }
  0xf9   : > { %v582_v54 = vadd.f32 %v2238_v46, %v581_v53  ;;  %v833_v57 = vmax.f32 %v579_v50, 0.0 }
  0xfa   : > { %v836_v56 = vmax.f32 %v590_v52, 0.0 }
  0xfb   : > { %v834_v58 = vmax.f32 %v582_v54, 0.0 }
  0xfc   : > { %v898_v59 = vpack.c.bf16 %v836_v56, %v835_v55 }
  0xfd   : > { %v1747_v60 = vpop.f32.mrb[4].mxu0  ;;  %v897_v61 = vpack.c.bf16 %v834_v58, %v833_v57 }
  0xfe   : > { %v603_v62 = vadd.f32 %v1747_v60, %v2238_v46  ;;  %v594_v63 = vpop.f32.mrb[5].mxu0 }
  0xff   : > { %v595_v0 = vadd.f32 %v2238_v46, %v594_v63  ;;  %v1748_v1 = vpop.f32.mrb[6].mxu0  ;;  %1821 = vmatprep.mubr.bf16.mxu1 %v897_v61 }
 0x100   : > { %v606_v2 = vadd.f32 %v1748_v1, %v2238_v46  ;;  %v597_v3 = vpop.f32.mrb[7].mxu0  ;;  %1822 = vmatmul.mubr.bf16.vlgmr.msra.gmra.mrb[0].mxu1 %v898_v59  ;;  %v839_v5 = vmax.f32 %v603_v62, 0.0 }
 0x101   : > { %v598_v4 = vadd.f32 %v2238_v46, %v597_v3  ;;  %v837_v7 = vmax.f32 %v595_v0, 0.0 }
 0x102   : > { %v840_v6 = vmax.f32 %v606_v2, 0.0 }
 0x103   : > { %v838_v8 = vmax.f32 %v598_v4, 0.0 }
 0x104   : > { %v900_v9 = vpack.c.bf16 %v840_v6, %v839_v5 }
 0x105   : > { %v899_v10 = vpack.c.bf16 %v838_v8, %v837_v7  ;;  %v1751_v11 = vpop.f32.mrb[8].mxu0 }
 0x106   : > { %v619_v12 = vadd.f32 %v1751_v11, %v2238_v46  ;;  %v610_v13 = vpop.f32.mrb[9].mxu0 }
 0x107   : > { %v611_v14 = vadd.f32 %v2238_v46, %v610_v13  ;;  %v1752_v15 = vpop.f32.mrb[10].mxu0  ;;  %1825 = vmatprep.mubr.bf16.mxu1 %v899_v10 }
 0x108   : > { %v622_v16 = vadd.f32 %v1752_v15, %v2238_v46  ;;  %v613_v17 = vpop.f32.mrb[11].mxu0  ;;  %1826 = vmatmul.mubr.bf16.gmra.mrb[4].mxu1 %v900_v9  ;;  %v843_v19 = vmax.f32 %v619_v12, 0.0 }
 0x109   : > { %v614_v18 = vadd.f32 %v2238_v46, %v613_v17  ;;  %v841_v21 = vmax.f32 %v611_v14, 0.0 }
 0x10a   : > { %v844_v20 = vmax.f32 %v622_v16, 0.0 }
 0x10b   : > { %v842_v22 = vmax.f32 %v614_v18, 0.0 }
 0x10c   : > { %v902_v23 = vpack.c.bf16 %v844_v20, %v843_v19 }
 0x10d   : > { %v901_v24 = vpack.c.bf16 %v842_v22, %v841_v21  ;;  %v1755_v25 = vpop.f32.mrb[12].mxu0 }
 0x10e   : > { %v635_v26 = vadd.f32 %v1755_v25, %v2238_v46  ;;  %v626_v27 = vpop.f32.mrb[13].mxu0 }
 0x10f   : > { %v627_v28 = vadd.f32 %v2238_v46, %v626_v27  ;;  %v1756_v29 = vpop.f32.mrb[14].mxu0  ;;  %1829 = vmatprep.mubr.bf16.mxu1 %v901_v24 }
 0x110   : > { %v638_v30 = vadd.f32 %v1756_v29, %v2238_v46  ;;  %v629_v31 = vpop.f32.mrb[15].mxu0  ;;  %1830 = vmatmul.mubr.bf16.gmra.mrb[8].mxu1 %v902_v23  ;;  %v847_v33 = vmax.f32 %v635_v26, 0.0 }
 0x111   : > { %v630_v32 = vadd.f32 %v2238_v46, %v629_v31  ;;  %v845_v35 = vmax.f32 %v627_v28, 0.0 }
 0x112   : > { %v848_v34 = vmax.f32 %v638_v30, 0.0 }
 0x113   : > { %v846_v36 = vmax.f32 %v630_v32, 0.0 }
 0x114   : > { %v904_v37 = vpack.c.bf16 %v848_v34, %v847_v33 }
 0x115   : > { %v903_v38 = vpack.c.bf16 %v846_v36, %v845_v35  ;;  %v1759_v39 = vpop.f32.mrb[16].mxu0 }
 0x116   : > { %v651_v40 = vadd.f32 %v1759_v39, %v2238_v46  ;;  %v642_v41 = vpop.f32.mrb[17].mxu0 }
 0x117   : > { %v643_v42 = vadd.f32 %v2238_v46, %v642_v41  ;;  %v1760_v43 = vpop.f32.mrb[18].mxu0  ;;  %1833 = vmatprep.mubr.bf16.mxu1 %v903_v38 }
 0x118   : > { %v654_v44 = vadd.f32 %v1760_v43, %v2238_v46  ;;  %v645_v45 = vpop.f32.mrb[19].mxu0  ;;  %1834 = vmatmul.mubr.bf16.gmra.mrb[12].mxu1 %v904_v37  ;;  %v851_v48 = vmax.f32 %v651_v40, 0.0 }
 0x119   : > { %v646_v47 = vadd.f32 %v2238_v46, %v645_v45  ;;  %v849_v50 = vmax.f32 %v643_v42, 0.0 }
 0x11a   : > { %v852_v49 = vmax.f32 %v654_v44, 0.0 }
 0x11b   : > { %v850_v51 = vmax.f32 %v646_v47, 0.0 }
 0x11c   : > { %v906_v52 = vpack.c.bf16 %v852_v49, %v851_v48 }
 0x11d   : > { %v905_v53 = vpack.c.bf16 %v850_v51, %v849_v50  ;;  %v1763_v54 = vpop.f32.mrb[20].mxu0 }
 0x11e   : > { %v667_v55 = vadd.f32 %v1763_v54, %v2238_v46  ;;  %v658_v56 = vpop.f32.mrb[21].mxu0 }
 0x11f   : > { %v659_v57 = vadd.f32 %v2238_v46, %v658_v56  ;;  %v1764_v58 = vpop.f32.mrb[22].mxu0  ;;  %1837 = vmatprep.mubr.bf16.mxu1 %v905_v53 }
 0x120   : > { %v670_v59 = vadd.f32 %v1764_v58, %v2238_v46  ;;  %v661_v60 = vpop.f32.mrb[23].mxu0  ;;  %1838 = vmatmul.mubr.bf16.gmra.mrb[16].mxu1 %v906_v52  ;;  %v855_v62 = vmax.f32 %v667_v55, 0.0 }
 0x121   : > { %v662_v61 = vadd.f32 %v2238_v46, %v661_v60  ;;  %v853_v0 = vmax.f32 %v659_v57, 0.0 }
 0x122   : > { %v856_v63 = vmax.f32 %v670_v59, 0.0 }
 0x123   : > { %v854_v1 = vmax.f32 %v662_v61, 0.0 }
 0x124   : > { %v908_v2 = vpack.c.bf16 %v856_v63, %v855_v62 }
 0x125   : > { %v907_v3 = vpack.c.bf16 %v854_v1, %v853_v0  ;;  %v1767_v4 = vpop.f32.mrb[24].mxu0 }
 0x126   : > { %v683_v5 = vadd.f32 %v1767_v4, %v2238_v46  ;;  %v674_v6 = vpop.f32.mrb[25].mxu0 }
 0x127   : > { %v675_v7 = vadd.f32 %v2238_v46, %v674_v6  ;;  %v1768_v8 = vpop.f32.mrb[26].mxu0  ;;  %1841 = vmatprep.mubr.bf16.mxu1 %v907_v3 }
 0x128   : > { %v686_v9 = vadd.f32 %v1768_v8, %v2238_v46  ;;  %v677_v10 = vpop.f32.mrb[27].mxu0  ;;  %1842 = vmatmul.mubr.bf16.gmra.mrb[20].mxu1 %v908_v2  ;;  %v859_v12 = vmax.f32 %v683_v5, 0.0 }
 0x129   : > { %v678_v11 = vadd.f32 %v2238_v46, %v677_v10  ;;  %v857_v14 = vmax.f32 %v675_v7, 0.0 }
 0x12a   : > { %v860_v13 = vmax.f32 %v686_v9, 0.0 }
 0x12b   : > { %v858_v15 = vmax.f32 %v678_v11, 0.0 }
 0x12c   : > { %v910_v16 = vpack.c.bf16 %v860_v13, %v859_v12 }
 0x12d   : > { %v909_v17 = vpack.c.bf16 %v858_v15, %v857_v14  ;;  %v1771_v18 = vpop.f32.mrb[28].mxu0 }
 0x12e   : > { %v699_v19 = vadd.f32 %v1771_v18, %v2238_v46  ;;  %v690_v20 = vpop.f32.mrb[29].mxu0 }
 0x12f   : > { %v691_v21 = vadd.f32 %v2238_v46, %v690_v20  ;;  %v1772_v22 = vpop.f32.mrb[30].mxu0  ;;  %1845 = vmatprep.mubr.bf16.mxu1 %v909_v17 }
 0x130   : > { %v702_v23 = vadd.f32 %v1772_v22, %v2238_v46  ;;  %v693_v24 = vpop.f32.mrb[31].mxu0  ;;  %1846 = vmatmul.mubr.bf16.gmra.mrb[24].mxu1 %v910_v16  ;;  %v863_v26 = vmax.f32 %v699_v19, 0.0 }
 0x131   : > { %v694_v25 = vadd.f32 %v2238_v46, %v693_v24  ;;  %v861_v28 = vmax.f32 %v691_v21, 0.0 }
 0x132   : > { %v864_v27 = vmax.f32 %v702_v23, 0.0 }
 0x133   : > { %v862_v29 = vmax.f32 %v694_v25, 0.0 }
 0x134   : > { %v912_v30 = vpack.c.bf16 %v864_v27, %v863_v26 }
 0x135   : > { %v911_v31 = vpack.c.bf16 %v862_v29, %v861_v28  ;;  %v1775_v32 = vpop.f32.mrb[32].mxu0 }
 0x136   : > { %v715_v33 = vadd.f32 %v1775_v32, %v2238_v46  ;;  %v706_v34 = vpop.f32.mrb[33].mxu0 }
 0x137   : > { %v707_v35 = vadd.f32 %v2238_v46, %v706_v34  ;;  %v1776_v36 = vpop.f32.mrb[34].mxu0  ;;  %1849 = vmatprep.mubr.bf16.mxu1 %v911_v31 }
 0x138   : > { %v718_v37 = vadd.f32 %v1776_v36, %v2238_v46  ;;  %v709_v38 = vpop.f32.mrb[35].mxu0  ;;  %1850 = vmatmul.mubr.bf16.gmra.mrb[28].mxu1 %v912_v30  ;;  %v867_v40 = vmax.f32 %v715_v33, 0.0 }
 0x139   : > { %v710_v39 = vadd.f32 %v2238_v46, %v709_v38  ;;  %v865_v42 = vmax.f32 %v707_v35, 0.0 }
 0x13a   : > { %v868_v41 = vmax.f32 %v718_v37, 0.0 }
 0x13b   : > { %v866_v43 = vmax.f32 %v710_v39, 0.0 }
 0x13c   : > { %v914_v44 = vpack.c.bf16 %v868_v41, %v867_v40 }
 0x13d   : > { %v913_v45 = vpack.c.bf16 %v866_v43, %v865_v42  ;;  %v1779_v47 = vpop.f32.mrb[36].mxu0 }
 0x13e   : > { %v731_v48 = vadd.f32 %v1779_v47, %v2238_v46  ;;  %v722_v49 = vpop.f32.mrb[37].mxu0 }
 0x13f   : > { %v723_v50 = vadd.f32 %v2238_v46, %v722_v49  ;;  %v1780_v51 = vpop.f32.mrb[38].mxu0  ;;  %1853 = vmatprep.mubr.bf16.mxu1 %v913_v45 }
 0x140   : > { %v734_v52 = vadd.f32 %v1780_v51, %v2238_v46  ;;  %v725_v53 = vpop.f32.mrb[39].mxu0  ;;  %1854 = vmatmul.mubr.bf16.gmra.mrb[32].mxu1 %v914_v44  ;;  %v871_v55 = vmax.f32 %v731_v48, 0.0 }
 0x141   : > { %v726_v54 = vadd.f32 %v2238_v46, %v725_v53  ;;  %v869_v57 = vmax.f32 %v723_v50, 0.0 }
 0x142   : > { %v872_v56 = vmax.f32 %v734_v52, 0.0 }
 0x143   : > { %v870_v58 = vmax.f32 %v726_v54, 0.0 }
 0x144   : > { %v916_v59 = vpack.c.bf16 %v872_v56, %v871_v55 }
 0x145   : > { %v915_v60 = vpack.c.bf16 %v870_v58, %v869_v57  ;;  %v1783_v61 = vpop.f32.mrb[40].mxu0 }
 0x146   : > { %v747_v62 = vadd.f32 %v1783_v61, %v2238_v46  ;;  %v738_v63 = vpop.f32.mrb[41].mxu0 }
 0x147   : > { %v739_v0 = vadd.f32 %v2238_v46, %v738_v63  ;;  %v1784_v1 = vpop.f32.mrb[42].mxu0  ;;  %1857 = vmatprep.mubr.bf16.mxu1 %v915_v60 }
 0x148   : > { %v750_v2 = vadd.f32 %v1784_v1, %v2238_v46  ;;  %v741_v3 = vpop.f32.mrb[43].mxu0  ;;  %1858 = vmatmul.mubr.bf16.gmra.mrb[36].mxu1 %v916_v59  ;;  %v875_v5 = vmax.f32 %v747_v62, 0.0 }
 0x149   : > { %v742_v4 = vadd.f32 %v2238_v46, %v741_v3  ;;  %v873_v7 = vmax.f32 %v739_v0, 0.0 }
 0x14a   : > { %v876_v6 = vmax.f32 %v750_v2, 0.0 }
 0x14b   : > { %v874_v8 = vmax.f32 %v742_v4, 0.0 }
 0x14c   : > { %v918_v9 = vpack.c.bf16 %v876_v6, %v875_v5 }
 0x14d   : > { %v917_v10 = vpack.c.bf16 %v874_v8, %v873_v7  ;;  %v1787_v11 = vpop.f32.mrb[44].mxu0 }
 0x14e   : > { %v763_v12 = vadd.f32 %v1787_v11, %v2238_v46  ;;  %v754_v13 = vpop.f32.mrb[45].mxu0 }
 0x14f   : > { %v755_v14 = vadd.f32 %v2238_v46, %v754_v13  ;;  %v1788_v15 = vpop.f32.mrb[46].mxu0  ;;  %1861 = vmatprep.mubr.bf16.mxu1 %v917_v10 }
 0x150   : > { %v766_v16 = vadd.f32 %v1788_v15, %v2238_v46  ;;  %v757_v17 = vpop.f32.mrb[47].mxu0  ;;  %1862 = vmatmul.mubr.bf16.gmra.mrb[40].mxu1 %v918_v9  ;;  %v879_v19 = vmax.f32 %v763_v12, 0.0 }
 0x151   : > { %v758_v18 = vadd.f32 %v2238_v46, %v757_v17  ;;  %v877_v21 = vmax.f32 %v755_v14, 0.0 }
 0x152   : > { %v880_v20 = vmax.f32 %v766_v16, 0.0 }
 0x153   : > { %v878_v22 = vmax.f32 %v758_v18, 0.0  ;;  %v2307_v18 = vld [vmem:[%s2484_s4] ss:$0 sm:$0xff] }
 0x154   : > { %v920_v23 = vpack.c.bf16 %v880_v20, %v879_v19 }
 0x155   : > { %v919_v24 = vpack.c.bf16 %v878_v22, %v877_v21  ;;  %v1791_v25 = vpop.f32.mrb[48].mxu0 }
 0x156   : > { %v779_v26 = vadd.f32 %v1791_v25, %v2238_v46  ;;  %v770_v27 = vpop.f32.mrb[49].mxu0 }
 0x157   : > { %v771_v28 = vadd.f32 %v2238_v46, %v770_v27  ;;  %v1792_v29 = vpop.f32.mrb[50].mxu0  ;;  %1865 = vmatprep.mubr.bf16.mxu1 %v919_v24 }
 0x158   : > { %v782_v30 = vadd.f32 %v1792_v29, %v2238_v46  ;;  %v773_v31 = vpop.f32.mrb[51].mxu0  ;;  %1866 = vmatmul.mubr.bf16.gmra.mrb[44].mxu1 %v920_v23  ;;  %v883_v33 = vmax.f32 %v779_v26, 0.0 }
 0x159   : > { %v774_v32 = vadd.f32 %v2238_v46, %v773_v31  ;;  %v881_v35 = vmax.f32 %v771_v28, 0.0 }
 0x15a   : > { %v884_v34 = vmax.f32 %v782_v30, 0.0 }
 0x15b   : > { %v882_v36 = vmax.f32 %v774_v32, 0.0 }
 0x15c   : > { %v922_v37 = vpack.c.bf16 %v884_v34, %v883_v33 }
 0x15d   : > { %v921_v38 = vpack.c.bf16 %v882_v36, %v881_v35  ;;  %v1795_v39 = vpop.f32.mrb[52].mxu0 }
 0x15e   : > { %v795_v40 = vadd.f32 %v1795_v39, %v2238_v46  ;;  %v786_v41 = vpop.f32.mrb[53].mxu0 }
 0x15f   : > { %1869 = vmatprep.mubr.bf16.mxu1 %v921_v38  ;;  %v787_v42 = vadd.f32 %v2238_v46, %v786_v41  ;;  %v1796_v43 = vpop.f32.mrb[54].mxu0 }
 0x160   : > { %1870 = vmatmul.mubr.bf16.gmra.mrb[48].mxu1 %v922_v37  ;;  %v887_v44 = vmax.f32 %v795_v40, 0.0  ;;  %v798_v45 = vadd.f32 %v1796_v43, %v2238_v46  ;;  %v789_v47 = vpop.f32.mrb[55].mxu0 }
 0x161   : > { %v885_v48 = vmax.f32 %v787_v42, 0.0  ;;  %v790_v49 = vadd.f32 %v2238_v46, %v789_v47 }
 0x162   : > { %v888_v50 = vmax.f32 %v798_v45, 0.0 }
 0x163   : > { %v886_v51 = vmax.f32 %v790_v49, 0.0 }
 0x164   : > { %v924_v52 = vpack.c.bf16 %v888_v50, %v887_v44 }
 0x165   : > { %v923_v53 = vpack.c.bf16 %v886_v51, %v885_v48  ;;  %v1799_v54 = vpop.f32.mrb[56].mxu0 }
 0x166   : > { %v811_v55 = vadd.f32 %v1799_v54, %v2238_v46  ;;  %v802_v56 = vpop.f32.mrb[57].mxu0 }
 0x167   : > { %1873 = vmatprep.mubr.bf16.mxu1 %v923_v53  ;;  %v803_v57 = vadd.f32 %v2238_v46, %v802_v56  ;;  %v1800_v58 = vpop.f32.mrb[58].mxu0 }
 0x168   : > { %1874 = vmatmul.mubr.bf16.gmra.mrb[52].mxu1 %v924_v52  ;;  %v891_v59 = vmax.f32 %v811_v55, 0.0  ;;  %v814_v60 = vadd.f32 %v1800_v58, %v2238_v46  ;;  %v805_v61 = vpop.f32.mrb[59].mxu0 }
 0x169   : > { %v889_v62 = vmax.f32 %v803_v57, 0.0  ;;  %v806_v63 = vadd.f32 %v2238_v46, %v805_v61 }
 0x16a   : > { %v892_v0 = vmax.f32 %v814_v60, 0.0 }
 0x16b   : > { %v890_v1 = vmax.f32 %v806_v63, 0.0 }
 0x16c   : > { %v926_v2 = vpack.c.bf16 %v892_v0, %v891_v59 }
 0x16d   : > { %v925_v3 = vpack.c.bf16 %v890_v1, %v889_v62  ;;  %v1803_v4 = vpop.f32.mrb[60].mxu0 }
 0x16e   : > { %v827_v5 = vadd.f32 %v1803_v4, %v2238_v46  ;;  %v818_v6 = vpop.f32.mrb[61].mxu0 }
 0x16f   : > { %1877 = vmatprep.mubr.bf16.mxu1 %v925_v3  ;;  %v819_v7 = vadd.f32 %v2238_v46, %v818_v6  ;;  %v1804_v8 = vpop.f32.mrb[62].mxu0 }
 0x170   : > { %1878 = vmatmul.mubr.bf16.gmra.mrb[56].mxu1 %v926_v2  ;;  %v895_v9 = vmax.f32 %v827_v5, 0.0  ;;  %v830_v10 = vadd.f32 %v1804_v8, %v2238_v46  ;;  %v821_v11 = vpop.f32.mrb[63].mxu0 }
 0x171   : > { %v893_v12 = vmax.f32 %v819_v7, 0.0  ;;  %v822_v13 = vadd.f32 %v2238_v46, %v821_v11 }
 0x172   : > { %v896_v14 = vmax.f32 %v830_v10, 0.0 }
 0x173   : > { %v894_v15 = vmax.f32 %v822_v13, 0.0 }
 0x174   : > { %v928_v16 = vpack.c.bf16 %v896_v14, %v895_v9 }
 0x175   : > { %v927_v17 = vpack.c.bf16 %v894_v15, %v893_v12 }
 0x177   : > { %1881 = vmatprep.mubr.bf16.mxu1 %v927_v17 }
 0x178   : > { %1882 = vmatmul.mubr.bf16.gmra.mrb[60].mxu1 %v928_v16 }
 0x1d3   : > { %v1823_v19 = vpop.f32.mrb[0].mxu1 }
 0x1d4   : > { %v1043_v20 = vadd.f32 %v1823_v19, %v2307_v18  ;;  %v1034_v21 = vpop.f32.mrb[1].mxu1  ;;  %v2347_v19 = vld [vmem:[%s2485_s5] sm:$0x3] }
 0x1d5   : > { %v1035_v22 = vadd.f32 %v2307_v18, %v1034_v21  ;;  %v1824_v23 = vpop.f32.mrb[2].mxu1  ;;  %1711 = vmatprep.mubr.bf16.mxu0 %v2347_v19  ;;  %1729 = vmatprep.mubr.bf16.mxu1 %v2347_v19 }
 0x1d6   : > { %v1046_v46 = vadd.f32 %v1824_v23, %v2307_v18  ;;  %v1037_v24 = vpop.f32.mrb[3].mxu1  ;;  %v1291_v26 = vmax.f32 %v1043_v20, 0.0 }
 0x1d7   : > { %v1038_v25 = vadd.f32 %v2307_v18, %v1037_v24  ;;  %v1289_v28 = vmax.f32 %v1035_v22, 0.0 }
 0x1d8   : > { %v1292_v27 = vmax.f32 %v1046_v46, 0.0 }
 0x1d9   : > { %v1290_v29 = vmax.f32 %v1038_v25, 0.0 }
 0x1da   : > { %v2313_v30 = vpack.c.bf16 %v1292_v27, %v1291_v26 }
 0x1db   : > { %v2315_v31 = vpack.c.bf16 %v1290_v29, %v1289_v28  ;;  %v1827_v32 = vpop.f32.mrb[4].mxu1 }
 0x1dc   : > { %v1059_v33 = vadd.f32 %v1827_v32, %v2307_v18  ;;  %v1050_v34 = vpop.f32.mrb[5].mxu1 }
 0x1dd   : > { %v1051_v35 = vadd.f32 %v2307_v18, %v1050_v34  ;;  %v1828_v36 = vpop.f32.mrb[6].mxu1 }
 0x1de   : > { %v1062_v37 = vadd.f32 %v1828_v36, %v2307_v18  ;;  %v1053_v38 = vpop.f32.mrb[7].mxu1  ;;  %v1295_v40 = vmax.f32 %v1059_v33, 0.0  ;;  %v1386_v33 = vld [vmem:[%s2486_s6] sm:$0xf]  ;;  %v2004_v36 = vmov 0  }
 0x1df   : > { %v1054_v39 = vadd.f32 %v2307_v18, %v1053_v38  ;;  %v1293_v42 = vmax.f32 %v1051_v35, 0.0  ;;  %1926 = vset.pattern.permute.xlu0 %v2004_v36 }
 0x1e0   : > { %v1296_v41 = vmax.f32 %v1062_v37, 0.0  ;;  %1389 = vperm.xlu0 %1926, %v1386_v33  }
 0x1e1   : > { %v1294_v43 = vmax.f32 %v1054_v39, 0.0 }
 0x1e2   : > { %v2321_v44 = vpack.c.bf16 %v1296_v41, %v1295_v40 }
 0x1e3   : > { %v2323_v45 = vpack.c.bf16 %v1294_v43, %v1293_v42  ;;  %v1831_v47 = vpop.f32.mrb[8].mxu1 }
 0x1e4   : > { %v1075_v48 = vadd.f32 %v1831_v47, %v2307_v18  ;;  %v1066_v49 = vpop.f32.mrb[9].mxu1 }
 0x1e5   : > { %v1067_v50 = vadd.f32 %v2307_v18, %v1066_v49  ;;  %v1832_v51 = vpop.f32.mrb[10].mxu1 }
 0x1e6   : > { %v1078_v52 = vadd.f32 %v1832_v51, %v2307_v18  ;;  %v1069_v53 = vpop.f32.mrb[11].mxu1  ;;  %v1299_v55 = vmax.f32 %v1075_v48, 0.0 }
 0x1e7   : > { %v1070_v54 = vadd.f32 %v2307_v18, %v1069_v53  ;;  %v1297_v57 = vmax.f32 %v1067_v50, 0.0 }
 0x1e8   : > { %v1300_v56 = vmax.f32 %v1078_v52, 0.0 }
 0x1e9   : > { %v1298_v58 = vmax.f32 %v1070_v54, 0.0 }
 0x1ea   : > { %v2329_v59 = vpack.c.bf16 %v1300_v56, %v1299_v55 }
 0x1eb   : > { %v2331_v60 = vpack.c.bf16 %v1298_v58, %v1297_v57  ;;  %v1835_v61 = vpop.f32.mrb[12].mxu1 }
 0x1ec   : > { %v1091_v62 = vadd.f32 %v1835_v61, %v2307_v18  ;;  %v1082_v63 = vpop.f32.mrb[13].mxu1 }
 0x1ed   : > { %v1083_v0 = vadd.f32 %v2307_v18, %v1082_v63  ;;  %v1836_v1 = vpop.f32.mrb[14].mxu1 }
 0x1ee   : > { %v1094_v2 = vadd.f32 %v1836_v1, %v2307_v18  ;;  %v1085_v3 = vpop.f32.mrb[15].mxu1  ;;  %v1303_v5 = vmax.f32 %v1091_v62, 0.0 }
 0x1ef   : > { %v1086_v4 = vadd.f32 %v2307_v18, %v1085_v3  ;;  %v1301_v7 = vmax.f32 %v1083_v0, 0.0 }
 0x1f0   : > { %v1304_v6 = vmax.f32 %v1094_v2, 0.0 }
 0x1f1   : > { %v1302_v8 = vmax.f32 %v1086_v4, 0.0 }
 0x1f2   : > { %v2337_v9 = vpack.c.bf16 %v1304_v6, %v1303_v5 }
 0x1f3   : > { %v2339_v10 = vpack.c.bf16 %v1302_v8, %v1301_v7  ;;  %v1839_v11 = vpop.f32.mrb[16].mxu1 }
 0x1f4   : > { %v1107_v12 = vadd.f32 %v1839_v11, %v2307_v18  ;;  %v1098_v13 = vpop.f32.mrb[17].mxu1 }
 0x1f5   : > { %v1099_v14 = vadd.f32 %v2307_v18, %v1098_v13  ;;  %v1840_v15 = vpop.f32.mrb[18].mxu1 }
 0x1f6   : > { %v1110_v16 = vadd.f32 %v1840_v15, %v2307_v18  ;;  %v1101_v17 = vpop.f32.mrb[19].mxu1  ;;  %v1307_v21 = vmax.f32 %v1107_v12, 0.0 }
 0x1f7   : > { %v1102_v20 = vadd.f32 %v2307_v18, %v1101_v17  ;;  %v1305_v23 = vmax.f32 %v1099_v14, 0.0 }
 0x1f8   : > { %v1308_v22 = vmax.f32 %v1110_v16, 0.0 }
 0x1f9   : > { %v1306_v46 = vmax.f32 %v1102_v20, 0.0 }
 0x1fa   : > { %v1362_v24 = vpack.c.bf16 %v1308_v22, %v1307_v21 }
 0x1fb   : > { %v1361_v25 = vpack.c.bf16 %v1306_v46, %v1305_v23  ;;  %v1843_v26 = vpop.f32.mrb[20].mxu1 }
 0x1fc   : > { %v1123_v27 = vadd.f32 %v1843_v26, %v2307_v18  ;;  %v1114_v28 = vpop.f32.mrb[21].mxu1 }
 0x1fd   : > { %v1115_v29 = vadd.f32 %v2307_v18, %v1114_v28  ;;  %v1844_v32 = vpop.f32.mrb[22].mxu1  ;;  %1695 = vmatprep.subr.bf16.mxu0 %v1361_v25 }
 0x1fe   : > { %v1126_v34 = vadd.f32 %v1844_v32, %v2307_v18  ;;  %v1117_v35 = vpop.f32.mrb[23].mxu1  ;;  %1696 = vmatpush3.bf16.xpose.msra.mxu0 %v2315_v31  ;;  %v1311_v38 = vmax.f32 %v1123_v27, 0.0 }
 0x1ff   : > { %v1118_v37 = vadd.f32 %v2307_v18, %v1117_v35  ;;  %1697 = vmatprep.subr.bf16.mxu0 %v1362_v24  ;;  %v1309_v40 = vmax.f32 %v1115_v29, 0.0 }
 0x200   : > { %v1312_v39 = vmax.f32 %v1126_v34, 0.0 }
 0x201   : > { %v1310_v41 = vmax.f32 %v1118_v37, 0.0 }
 0x202   : > { %v1364_v42 = vpack.c.bf16 %v1312_v39, %v1311_v38 }
 0x203   : > { %v1363_v43 = vpack.c.bf16 %v1310_v41, %v1309_v40  ;;  %v1847_v47 = vpop.f32.mrb[24].mxu1 }
 0x204   : > { %v1139_v48 = vadd.f32 %v1847_v47, %v2307_v18  ;;  %v1130_v49 = vpop.f32.mrb[25].mxu1 }
 0x205   : > { %v1131_v50 = vadd.f32 %v2307_v18, %v1130_v49  ;;  %v1848_v51 = vpop.f32.mrb[26].mxu1 }
 0x206   : > { %v1142_v31 = vadd.f32 %v1848_v51, %v2307_v18  ;;  %v1133_v52 = vpop.f32.mrb[27].mxu1  ;;  %1698 = vmatpush3.bf16.xpose.msra.mxu0 %v2313_v30  ;;  %v1315_v54 = vmax.f32 %v1139_v48, 0.0 }
 0x207   : > { %v1134_v53 = vadd.f32 %v2307_v18, %v1133_v52  ;;  %1699 = vmatprep.subr.bf16.mxu0 %v1363_v43  ;;  %v1313_v56 = vmax.f32 %v1131_v50, 0.0 }
 0x208   : > { %v1316_v55 = vmax.f32 %v1142_v31, 0.0 }
 0x209   : > { %v1314_v57 = vmax.f32 %v1134_v53, 0.0 }
 0x20a   : > { %v1366_v58 = vpack.c.bf16 %v1316_v55, %v1315_v54 }
 0x20b   : > { %v1365_v61 = vpack.c.bf16 %v1314_v57, %v1313_v56  ;;  %v1851_v62 = vpop.f32.mrb[28].mxu1 }
 0x20c   : > { %v1155_v63 = vadd.f32 %v1851_v62, %v2307_v18  ;;  %v1146_v0 = vpop.f32.mrb[29].mxu1 }
 0x20d   : > { %v1147_v1 = vadd.f32 %v2307_v18, %v1146_v0  ;;  %v1852_v2 = vpop.f32.mrb[30].mxu1 }
 0x20e   : > { %v1158_v3 = vadd.f32 %v1852_v2, %v2307_v18  ;;  %v1149_v4 = vpop.f32.mrb[31].mxu1  ;;  %1700 = vmatpush3.bf16.xpose.msra.mxu0 %v2323_v45  ;;  %v1319_v5 = vmax.f32 %v1155_v63, 0.0 }
 0x20f   : > { %v1150_v30 = vadd.f32 %v2307_v18, %v1149_v4  ;;  %1701 = vmatprep.subr.bf16.mxu0 %v1364_v42  ;;  %v1317_v7 = vmax.f32 %v1147_v1, 0.0 }
 0x210   : > { %v1320_v6 = vmax.f32 %v1158_v3, 0.0 }
 0x211   : > { %v1318_v8 = vmax.f32 %v1150_v30, 0.0 }
 0x212   : > { %v1368_v11 = vpack.c.bf16 %v1320_v6, %v1319_v5 }
 0x213   : > { %v1367_v12 = vpack.c.bf16 %v1318_v8, %v1317_v7  ;;  %v1855_v13 = vpop.f32.mrb[32].mxu1 }
 0x214   : > { %v1171_v14 = vadd.f32 %v1855_v13, %v2307_v18  ;;  %v1162_v15 = vpop.f32.mrb[33].mxu1 }
 0x215   : > { %v1163_v16 = vadd.f32 %v2307_v18, %v1162_v15  ;;  %v1856_v17 = vpop.f32.mrb[34].mxu1 }
 0x216   : > { %v1174_v20 = vadd.f32 %v1856_v17, %v2307_v18  ;;  %v1165_v21 = vpop.f32.mrb[35].mxu1  ;;  %1702 = vmatpush3.bf16.xpose.msra.mxu0 %v2321_v44  ;;  %v1323_v22 = vmax.f32 %v1171_v14, 0.0 }
 0x217   : > { %v1166_v45 = vadd.f32 %v2307_v18, %v1165_v21  ;;  %1703 = vmatprep.subr.bf16.mxu0 %v1365_v61  ;;  %v1321_v46 = vmax.f32 %v1163_v16, 0.0 }
 0x218   : > { %v1324_v23 = vmax.f32 %v1174_v20, 0.0 }
 0x219   : > { %v1322_v24 = vmax.f32 %v1166_v45, 0.0 }
 0x21a   : > { %v2375_v25 = vpack.c.bf16 %v1324_v23, %v1323_v22 }
 0x21b   : > { %v2377_v26 = vpack.c.bf16 %v1322_v24, %v1321_v46  ;;  %v1859_v27 = vpop.f32.mrb[36].mxu1 }
 0x21c   : > { %v1187_v28 = vadd.f32 %v1859_v27, %v2307_v18  ;;  %v1178_v29 = vpop.f32.mrb[37].mxu1 }
 0x21d   : > { %v1179_v32 = vadd.f32 %v2307_v18, %v1178_v29  ;;  %v1860_v33 = vpop.f32.mrb[38].mxu1 }
 0x21e   : > { %v1190_v44 = vadd.f32 %v1860_v33, %v2307_v18  ;;  %v1181_v34 = vpop.f32.mrb[39].mxu1  ;;  %1704 = vmatpush3.bf16.xpose.msra.mxu0 %v2331_v60  ;;  %v1327_v36 = vmax.f32 %v1187_v28, 0.0 }
 0x21f   : > { %v1182_v35 = vadd.f32 %v2307_v18, %v1181_v34  ;;  %1705 = vmatprep.subr.bf16.mxu0 %v1366_v58  ;;  %v1325_v38 = vmax.f32 %v1179_v32, 0.0 }
 0x220   : > { %v1328_v37 = vmax.f32 %v1190_v44, 0.0 }
 0x221   : > { %v1326_v39 = vmax.f32 %v1182_v35, 0.0 }
 0x222   : > { %v2384_v40 = vpack.c.bf16 %v1328_v37, %v1327_v36 }
 0x223   : > { %v2386_v41 = vpack.c.bf16 %v1326_v39, %v1325_v38  ;;  %v1863_v42 = vpop.f32.mrb[40].mxu1 }
 0x224   : > { %v1203_v43 = vadd.f32 %v1863_v42, %v2307_v18  ;;  %v1194_v47 = vpop.f32.mrb[41].mxu1 }
 0x225   : > { %v1195_v48 = vadd.f32 %v2307_v18, %v1194_v47  ;;  %v1864_v49 = vpop.f32.mrb[42].mxu1 }
 0x226   : > { %v1206_v60 = vadd.f32 %v1864_v49, %v2307_v18  ;;  %v1197_v50 = vpop.f32.mrb[43].mxu1  ;;  %1706 = vmatpush3.bf16.xpose.msra.mxu0 %v2329_v59  ;;  %v1331_v31 = vmax.f32 %v1203_v43, 0.0 }
 0x227   : > { %v1198_v51 = vadd.f32 %v2307_v18, %v1197_v50  ;;  %1707 = vmatprep.subr.bf16.mxu0 %v1367_v12  ;;  %v1329_v53 = vmax.f32 %v1195_v48, 0.0 }
 0x228   : > { %v1332_v52 = vmax.f32 %v1206_v60, 0.0 }
 0x229   : > { %v1330_v54 = vmax.f32 %v1198_v51, 0.0 }
 0x22a   : > { %v2393_v55 = vpack.c.bf16 %v1332_v52, %v1331_v31 }
 0x22b   : > { %v2395_v56 = vpack.c.bf16 %v1330_v54, %v1329_v53  ;;  %v1867_v57 = vpop.f32.mrb[44].mxu1 }
 0x22c   : > { %v1219_v58 = vadd.f32 %v1867_v57, %v2307_v18  ;;  %v1210_v61 = vpop.f32.mrb[45].mxu1 }
 0x22d   : > { %v1211_v62 = vadd.f32 %v2307_v18, %v1210_v61  ;;  %v1868_v63 = vpop.f32.mrb[46].mxu1 }
 0x22e   : > { %v1222_v59 = vadd.f32 %v1868_v63, %v2307_v18  ;;  %v1213_v0 = vpop.f32.mrb[47].mxu1  ;;  %1708 = vmatpush3.bf16.xpose.msra.mxu0 %v2339_v10  ;;  %v1335_v2 = vmax.f32 %v1219_v58, 0.0 }
 0x22f   : > { %v1214_v1 = vadd.f32 %v2307_v18, %v1213_v0  ;;  %1709 = vmatprep.subr.bf16.mxu0 %v1368_v11  ;;  %v1333_v4 = vmax.f32 %v1211_v62, 0.0 }
 0x230   : > { %v1336_v3 = vmax.f32 %v1222_v59, 0.0 }
 0x231   : > { %v1334_v30 = vmax.f32 %v1214_v1, 0.0 }
 0x232   : > { %v2402_v5 = vpack.c.bf16 %v1336_v3, %v1335_v2 }
 0x233   : > { %v2404_v6 = vpack.c.bf16 %v1334_v30, %v1333_v4  ;;  %v1871_v7 = vpop.f32.mrb[48].mxu1 }
 0x234   : > { %v1235_v8 = vadd.f32 %v1871_v7, %v2307_v18  ;;  %v1226_v12 = vpop.f32.mrb[49].mxu1 }
 0x235   : > { %v1227_v13 = vadd.f32 %v2307_v18, %v1226_v12  ;;  %v1872_v14 = vpop.f32.mrb[50].mxu1 }
 0x236   : > { %v1238_v10 = vadd.f32 %v1872_v14, %v2307_v18  ;;  %v1229_v15 = vpop.f32.mrb[51].mxu1  ;;  %1710 = vmatpush3.bf16.xpose.msra.mxu0 %v2337_v9  ;;  %v1339_v16 = vmax.f32 %v1235_v8, 0.0 }
 0x237   : > { %v1230_v11 = vadd.f32 %v2307_v18, %v1229_v15  ;;  %v1337_v20 = vmax.f32 %v1227_v13, 0.0 }
 0x238   : > { %v1340_v17 = vmax.f32 %v1238_v10, 0.0 }
 0x239   : > { %v1338_v21 = vmax.f32 %v1230_v11, 0.0 }
 0x23a   : > { %v1378_v45 = vpack.c.bf16 %v1340_v17, %v1339_v16 }
 0x23b   : > { %v1377_v22 = vpack.c.bf16 %v1338_v21, %v1337_v20  ;;  %v1875_v23 = vpop.f32.mrb[52].mxu1 }
 0x23c   : > { %v1251_v46 = vadd.f32 %v1875_v23, %v2307_v18  ;;  %v1242_v24 = vpop.f32.mrb[53].mxu1 }
 0x23d   : > { %1713 = vmatprep.subr.bf16.mxu1 %v1377_v22  ;;  %v1243_v27 = vadd.f32 %v2307_v18, %v1242_v24  ;;  %v1876_v28 = vpop.f32.mrb[54].mxu1  ;;  %1712 = vmatmul.mubr.bf16.vlgmr.msra.gmra.mrb[64].mxu0 %v2347_v19 }
 0x23e   : > { %1714 = vmatpush3.bf16.xpose.msra.mxu1 %v2377_v26  ;;  %v1343_v9 = vmax.f32 %v1251_v46, 0.0  ;;  %v1254_v29 = vadd.f32 %v1876_v28, %v2307_v18  ;;  %v1245_v32 = vpop.f32.mrb[55].mxu1 }
 0x23f   : > { %1715 = vmatprep.subr.bf16.mxu1 %v1378_v45  ;;  %v1341_v33 = vmax.f32 %v1243_v27, 0.0  ;;  %v1246_v44 = vadd.f32 %v2307_v18, %v1245_v32 }
 0x240   : > { %v1344_v34 = vmax.f32 %v1254_v29, 0.0 }
 0x241   : > { %v1342_v35 = vmax.f32 %v1246_v44, 0.0 }
 0x242   : > { %v1380_v36 = vpack.c.bf16 %v1344_v34, %v1343_v9 }
 0x243   : > { %v1379_v37 = vpack.c.bf16 %v1342_v35, %v1341_v33  ;;  %v1879_v38 = vpop.f32.mrb[56].mxu1 }
 0x244   : > { %v1267_v39 = vadd.f32 %v1879_v38, %v2307_v18  ;;  %v1258_v42 = vpop.f32.mrb[57].mxu1 }
 0x245   : > { %v1259_v43 = vadd.f32 %v2307_v18, %v1258_v42  ;;  %v1880_v47 = vpop.f32.mrb[58].mxu1 }
 0x246   : > { %1716 = vmatpush3.bf16.xpose.msra.mxu1 %v2375_v25  ;;  %v1347_v26 = vmax.f32 %v1267_v39, 0.0  ;;  %v1270_v48 = vadd.f32 %v1880_v47, %v2307_v18  ;;  %v1261_v49 = vpop.f32.mrb[59].mxu1 }
 0x247   : > { %1717 = vmatprep.subr.bf16.mxu1 %v1379_v37  ;;  %v1345_v60 = vmax.f32 %v1259_v43, 0.0  ;;  %v1262_v50 = vadd.f32 %v2307_v18, %v1261_v49 }
 0x248   : > { %v1348_v51 = vmax.f32 %v1270_v48, 0.0 }
 0x249   : > { %v1346_v31 = vmax.f32 %v1262_v50, 0.0 }
 0x24a   : > { %v1382_v52 = vpack.c.bf16 %v1348_v51, %v1347_v26 }
 0x24b   : > { %v1381_v53 = vpack.c.bf16 %v1346_v31, %v1345_v60  ;;  %v1883_v54 = vpop.f32.mrb[60].mxu1 }
 0x24c   : > { %v1283_v57 = vadd.f32 %v1883_v54, %v2307_v18  ;;  %v1274_v58 = vpop.f32.mrb[61].mxu1 }
 0x24d   : > { %v1275_v61 = vadd.f32 %v2307_v18, %v1274_v58  ;;  %v1884_v62 = vpop.f32.mrb[62].mxu1 }
 0x24e   : > { %1718 = vmatpush3.bf16.xpose.msra.mxu1 %v2386_v41  ;;  %v1351_v25 = vmax.f32 %v1283_v57, 0.0  ;;  %v1286_v63 = vadd.f32 %v1884_v62, %v2307_v18  ;;  %v1277_v59 = vpop.f32.mrb[63].mxu1 }
 0x24f   : > { %1719 = vmatprep.subr.bf16.mxu1 %v1380_v36  ;;  %v1349_v0 = vmax.f32 %v1275_v61, 0.0  ;;  %v1278_v1 = vadd.f32 %v2307_v18, %v1277_v59 }
 0x250   : > { %v1352_v2 = vmax.f32 %v1286_v63, 0.0 }
 0x251   : > { %v1350_v3 = vmax.f32 %v1278_v1, 0.0 }
 0x252   : > { %v1384_v4 = vpack.c.bf16 %v1352_v2, %v1351_v25 }
 0x253   : > { %v1383_v30 = vpack.c.bf16 %v1350_v3, %v1349_v0 }
 0x256   : > { %1720 = vmatpush3.bf16.xpose.msra.mxu1 %v2384_v40 }
 0x257   : > { %1721 = vmatprep.subr.bf16.mxu1 %v1381_v53 }
 0x25e   : > { %1722 = vmatpush3.bf16.xpose.msra.mxu1 %v2395_v56 }
 0x25f   : > { %1723 = vmatprep.subr.bf16.mxu1 %v1382_v52  ;;  %v1390_v18 = vpop.permute.xlu0 %1389 }
 0x266   : > { %1724 = vmatpush3.bf16.xpose.msra.mxu1 %v2393_v55 }
 0x267   : > { %1725 = vmatprep.subr.bf16.mxu1 %v1383_v30 }
 0x26e   : > { %1726 = vmatpush3.bf16.xpose.msra.mxu1 %v2404_v6 }
 0x26f   : > { %1727 = vmatprep.subr.bf16.mxu1 %v1384_v4 }
 0x276   : > { %1728 = vmatpush3.bf16.xpose.msra.mxu1 %v2402_v5 }
 0x27d   : > { %1730 = vmatmul.mubr.bf16.vlgmr.msra.gmra.mrb[64].mxu1 %v2347_v19 }
 0x310   : > { %v1426_v41 = vpop.f32.mrb[64].mxu0 }
 0x311   : > { %v1428_v40 = vpop.f32.mrb[65].mxu0  ;;  %v1427_v7 = vadd.f32 %v1426_v41, %v1390_v18 }
 0x312   : > { %v1430_v8 = vpop.f32.mrb[66].mxu0  ;;  %v1429_v56 = vadd.f32 %v1428_v40, %v1390_v18 }
 0x313   : > { %v1431_v12 = vpop.f32.mrb[67].mxu0 }
 0x314   : > { %v1478_v13 = vcombine.low %v1427_v7, %v1429_v56 }
 0x316   : > { %1482 = vst [vmem:[%s284_s13] sm:$0xff] %v1478_v13 }
 0x350   : > { %v1467_v55 = vpop.f32.mrb[64].mxu1 }
 0x351   : > { %v1469_v6 = vpop.f32.mrb[65].mxu1  ;;  %v1468_v14 = vadd.f32 %v1467_v55, %v1390_v18 }
 0x352   : > { %v1471_v19 = vpop.f32.mrb[66].mxu1  ;;  %v1470_v5 = vadd.f32 %v1469_v6, %v1390_v18 }
 0x353   : > { %v1472_v10 = vpop.f32.mrb[67].mxu1 }
 0x354   : > { %v1479_v15 = vcombine.low %v1468_v14, %v1470_v5 }
 0x356   : > { %1483 = vst [vmem:[%s284_s13 + $0x8] sm:$0xff] %v1479_v15 }
 0x357   : > { %1953 = shalt.err (!%p1950_p3)
}
 0x358   : > { %s1954_s22 = scalar_lea.hbm %s2438_s18, 256  ;;  %s1958_s9 = scalar_lea.hbm %s2487_s7, 512 }
 0x359   : > { %p1955_p4 = scmp.ne.s32.totalorder %s2438_s18, %s1954_s22  ;;  %p1959_p9 = scmp.lt.u32.totalorder %s2438_s18, %s2487_s7 }
 0x35a   : > { %p1960_p10 = scmp.lt.u32.totalorder %s1958_s9, %s1954_s22  ;;  %p1962_p12 = scmp.lt.u32.totalorder %s1954_s22, %s2438_s18 }
 0x35b   : > { %p1956_p7 = pnand %p1955_p4, %p2084_p5 }
 0x35c   : > { %p1961_p11 = por %p1960_p10, %p1959_p9 }
 0x35d   : > { %p1957_p8 = pneg %p1956_p7 }
 0x35e   : > { %p1963_p13 = por %p1962_p12, %p1961_p11 }
 0x360   : > { %p1964_p0 = pnand %p1963_p13, %p1957_p8 }
 0x362   : > { %1967 = shalt.err (!%p1964_p0)
}
 0x363   : > { %1886 = dma.vmem_to_hbm [thread:$0]  (%p2084_p5), %s2440_s15, 256, %s2438_s18, %s1485_s8  }
 0x364 PF: > { %p1892_p1 = scmp.ge.s32.totalorder %s2002_s27, 2  ;;  %s1511_s16 = sand.u32 1, %s1990_s24  }
 0x365   : > { %s1512_s17 = scalar_lea.sflag [#allocation3], %s1511_s16 }
 0x366   : > { %p1889_p2 = pnand %p1892_p1, %p2088_p6 }
 0x368   : > { %1985 = dma.done.wait (!%p1889_p2), %s1512_s17, 256  }
 0x369   : > { %1987 = vsyncadd (!%p1889_p2), %s1512_s17, 4294967040  ;;  %p17_p3 = scmp.ge.s32.totalorder %s2071_s30, 4   ;;  %s2490_s24 = smov %s1994_s25 }
 0x36a   : > { %s2491_s25 = smov %s1998_s26  ;;  %s2492_s26 = smov %s2082_s10 }
 0x36b   : > { %s2493_s27 = smov %s2071_s30  ;;  %19 = sbr.rel (!%p17_p3) target bundleno = 3 (0x3), region = 83 }
 0x372   :  { %1517 = vsyncpa [#allocation3], 1 }
 0x373   :  { %1519 = vsyncpa [#allocation3 + $0x1], 1 }

</bundles_post_ra>
